<compile_context>
chip_gen: v7x
topology: tpu7x:2x2x1
jax: 0.10.0
libtpu: 0.0.40
codegen_flags: <defaults>
</compile_context>

<pallas_src>
import jax
import jax.numpy as jnp
from jax.experimental import pallas as pl
from jax.experimental.pallas import tpu as pltpu

H_PAD = 128   # hidden dim (100) zero-padded to the full 128-lane width
LANE = 128    # lane width / batch-tile granularity


def _round_up(n, m):
    return (n + m - 1) // m * m


def actor_kernel(xt_ref, w1t_ref, b1_ref, w2_ref, b2_ref, o_ref):
    """One batch tile.

    xt_ref : (3, TB)      features on sublanes, batch on lanes
    w1t_ref: (H_PAD, 3)   transposed, hidden-padded layer-1 weight
    b1_ref : (H_PAD, 1)   layer-1 bias (column)
    w2_ref : (H_PAD, 1)   layer-2 weight (column)
    b2_ref : (1, 1)       layer-2 bias
    o_ref  : (1, TB)      lane-dense output (batch on lanes)
    """
    xt = xt_ref[...]
    w1t = w1t_ref[...]
    # Layer 1 as 3 broadcast FMAs on the VPU (K=3 is too shallow for the MXU):
    # h[j, n] = sum_k w1t[j, k] * x[n, k] + b1[j]
    h = (w1t[:, 0:1] * xt[0:1, :]
         + w1t[:, 1:2] * xt[1:2, :]
         + w1t[:, 2:3] * xt[2:3, :]
         + b1_ref[...])
    h = jnp.maximum(h, 0.0)                                        # ReLU (VPU)
    # Layer 2 (out_features = 1): VPU multiply + reduction, no N=1 MXU round trip.
    y = jnp.sum(h * w2_ref[...], axis=0, keepdims=True) + b2_ref[...]
    o_ref[...] = 2.0 * jnp.tanh(y)                                 # 2*tanh (EUP)


def actor_forward(x, w1, b1, w2, b2, *, max_tb=1024):
    """x: (B, 3), w1: (3, 100), b1: (1, 100) or (100,), w2: (100, 1), b2: (1, 1).

    Returns (B, 1) float32, identical semantics to the PyTorch Actor.forward.
    """
    B = x.shape[0]
    hidden = w1.shape[1]

    # --- Parameter re-layout (tiny, done once per call in the wrapper) ---------
    w1t = jnp.zeros((H_PAD, 3), jnp.float32).at[:hidden, :].set(w1.T)
    b1c = jnp.zeros((H_PAD, 1), jnp.float32).at[:hidden, 0].set(jnp.reshape(b1, (-1,)))
    w2c = jnp.zeros((H_PAD, 1), jnp.float32).at[:hidden, 0].set(jnp.reshape(w2, (-1,)))
    b2c = jnp.reshape(b2, (1, 1)).astype(jnp.float32)

    # --- Batch tiling: batch rides the lanes, padded to a multiple of 128 ------
    TB = min(_round_up(B, LANE), max_tb)
    B_pad = _round_up(B, TB)
    xt = jnp.zeros((3, B_pad), jnp.float32).at[:, :B].set(x.T.astype(jnp.float32))
    num_tiles = B_pad // TB

    if num_tiles == 1:
        # Small batch: everything fits as full VMEM blocks; no grid machinery.
        out_t = pl.pallas_call(
            actor_kernel,
            out_shape=jax.ShapeDtypeStruct((1, B_pad), jnp.float32),
        )(xt, w1t, b1c, w2c, b2c)
    else:
        # Large batch: pipeline over batch tiles; weights stay VMEM-resident
        # (constant block index), batch axis is embarrassingly parallel.
        out_t = pl.pallas_call(
            actor_kernel,
            out_shape=jax.ShapeDtypeStruct((1, B_pad), jnp.float32),
            grid=(num_tiles,),
            in_specs=[
                pl.BlockSpec((3, TB), lambda i: (0, i)),
                pl.BlockSpec((H_PAD, 3), lambda i: (0, 0)),
                pl.BlockSpec((H_PAD, 1), lambda i: (0, 0)),
                pl.BlockSpec((H_PAD, 1), lambda i: (0, 0)),
                pl.BlockSpec((1, 1), lambda i: (0, 0)),
            ],
            out_specs=pl.BlockSpec((1, TB), lambda i: (0, i)),
            compiler_params=pltpu.CompilerParams(
                dimension_semantics=("parallel",)),
        )(xt, w1t, b1c, w2c, b2c)

    # Strip batch padding and return PyTorch-shaped (B, 1).
    return out_t[0, :B].reshape(B, 1)


def init_params(key):
    """Deterministic init mimicking nn.Linear defaults (uniform +/- 1/sqrt(fan_in))."""
    k1, k2, k3, k4 = jax.random.split(key, 4)
    bound1 = 1.0 / jnp.sqrt(3.0)    # layer1: in_features = 3
    bound2 = 1.0 / jnp.sqrt(100.0)  # layer2: in_features = 100
    w1 = jax.random.uniform(k1, (3, 100), jnp.float32, -bound1, bound1)
    b1 = jax.random.uniform(k2, (1, 100), jnp.float32, -bound1, bound1)
    w2 = jax.random.uniform(k3, (100, 1), jnp.float32, -bound2, bound2)
    b2 = jax.random.uniform(k4, (1, 1), jnp.float32, -bound2, bound2)
    return w1, b1, w2, b2


def _reference(x, w1, b1, w2, b2):
    return 2.0 * jnp.tanh(jnp.maximum(x @ w1 + b1, 0.0) @ w2 + b2)


if __name__ == "__main__":
    key = jax.random.PRNGKey(0)
    kx, kx2, kp = jax.random.split(key, 3)
    w1, b1, w2, b2 = init_params(kp)

    # Case 1: small batch -> single full-block call (no grid).
    B1 = 8
    x1 = jax.random.normal(kx, (B1, 3), jnp.float32)
    out1 = actor_forward(x1, w1, b1, w2, b2)
    jax.block_until_ready(out1)
    ref1 = _reference(x1, w1, b1, w2, b2)
    assert out1.shape == (B1, 1)
    assert jnp.allclose(out1, ref1, atol=1e-5, rtol=1e-5)

    # Case 2: force the batch-tiled (gridded, parallel) path with small tiles.
    B2 = 300
    x2 = jax.random.normal(kx2, (B2, 3), jnp.float32)
    out2 = actor_forward(x2, w1, b1, w2, b2, max_tb=128)   # 3 batch tiles of 128
    jax.block_until_ready(out2)
    ref2 = _reference(x2, w1, b1, w2, b2)
    assert out2.shape == (B2, 1)
    assert jnp.allclose(out2, ref2, atol=1e-5, rtol=1e-5)

    print("KERNEL_OK")
</pallas_src>

<mosaic_0001>
module attributes {stable_mosaic.version = 11 : i64} {
  func.func @actor_kernel(%arg0: memref<3x128xf32, #tpu.memory_space<vmem>>, %arg1: memref<128x3xf32, #tpu.memory_space<vmem>>, %arg2: memref<128x1xf32, #tpu.memory_space<vmem>>, %arg3: memref<128x1xf32, #tpu.memory_space<vmem>>, %arg4: memref<1x1xf32, #tpu.memory_space<vmem>>, %arg5: memref<1x128xf32, #tpu.memory_space<vmem>>) attributes {dimension_semantics = [], scalar_prefetch = 0 : i64, scratch_operands = 0 : i64, tpu.core_type = #tpu.core_type<tc>} {
    %c0 = arith.constant 0 : index
    %c0_0 = arith.constant 0 : index
    %0 = vector.load %arg0[%c0, %c0_0] : memref<3x128xf32, #tpu.memory_space<vmem>>, vector<3x128xf32>
    %c0_1 = arith.constant 0 : index
    %c0_2 = arith.constant 0 : index
    %1 = vector.load %arg1[%c0_1, %c0_2] : memref<128x3xf32, #tpu.memory_space<vmem>>, vector<128x3xf32>
    %2 = vector.extract_strided_slice %1 {offsets = [0, 0], sizes = [128, 1], strides = [1, 1]} : vector<128x3xf32> to vector<128x1xf32>
    %3 = vector.extract_strided_slice %0 {offsets = [0, 0], sizes = [1, 128], strides = [1, 1]} : vector<3x128xf32> to vector<1x128xf32>
    %4 = vector.broadcast %2 : vector<128x1xf32> to vector<128x128xf32>
    %5 = vector.broadcast %3 : vector<1x128xf32> to vector<128x128xf32>
    %6 = arith.mulf %4, %5 : vector<128x128xf32>
    %7 = vector.extract_strided_slice %1 {offsets = [0, 1], sizes = [128, 1], strides = [1, 1]} : vector<128x3xf32> to vector<128x1xf32>
    %8 = vector.extract_strided_slice %0 {offsets = [1, 0], sizes = [1, 128], strides = [1, 1]} : vector<3x128xf32> to vector<1x128xf32>
    %9 = vector.broadcast %7 : vector<128x1xf32> to vector<128x128xf32>
    %10 = vector.broadcast %8 : vector<1x128xf32> to vector<128x128xf32>
    %11 = arith.mulf %9, %10 : vector<128x128xf32>
    %12 = arith.addf %6, %11 : vector<128x128xf32>
    %13 = vector.extract_strided_slice %1 {offsets = [0, 2], sizes = [128, 1], strides = [1, 1]} : vector<128x3xf32> to vector<128x1xf32>
    %14 = vector.extract_strided_slice %0 {offsets = [2, 0], sizes = [1, 128], strides = [1, 1]} : vector<3x128xf32> to vector<1x128xf32>
    %15 = vector.broadcast %13 : vector<128x1xf32> to vector<128x128xf32>
    %16 = vector.broadcast %14 : vector<1x128xf32> to vector<128x128xf32>
    %17 = arith.mulf %15, %16 : vector<128x128xf32>
    %18 = arith.addf %12, %17 : vector<128x128xf32>
    %c0_3 = arith.constant 0 : index
    %c0_4 = arith.constant 0 : index
    %19 = vector.load %arg2[%c0_3, %c0_4] : memref<128x1xf32, #tpu.memory_space<vmem>>, vector<128x1xf32>
    %20 = vector.broadcast %19 : vector<128x1xf32> to vector<128x128xf32>
    %21 = arith.addf %18, %20 : vector<128x128xf32>
    %cst = arith.constant 0.000000e+00 : f32
    %22 = vector.broadcast %cst : f32 to vector<128x128xf32>
    %23 = arith.maximumf %21, %22 : vector<128x128xf32>
    %c0_5 = arith.constant 0 : index
    %c0_6 = arith.constant 0 : index
    %24 = vector.load %arg3[%c0_5, %c0_6] : memref<128x1xf32, #tpu.memory_space<vmem>>, vector<128x1xf32>
    %25 = vector.broadcast %24 : vector<128x1xf32> to vector<128x128xf32>
    %26 = arith.mulf %23, %25 : vector<128x128xf32>
    %cst_7 = arith.constant dense<0.000000e+00> : vector<128xf32>
    %27 = vector.multi_reduction <add>, %26, %cst_7 [0] : vector<128x128xf32> to vector<128xf32>
    %28 = vector.shape_cast %27 : vector<128xf32> to vector<1x128xf32>
    %c0_8 = arith.constant 0 : index
    %c0_9 = arith.constant 0 : index
    %29 = vector.load %arg4[%c0_8, %c0_9] : memref<1x1xf32, #tpu.memory_space<vmem>>, vector<1x1xf32>
    %30 = vector.broadcast %29 : vector<1x1xf32> to vector<1x128xf32>
    %31 = arith.addf %28, %30 : vector<1x128xf32>
    %32 = math.tanh %31 : vector<1x128xf32>
    %cst_10 = arith.constant 2.000000e+00 : f32
    %33 = vector.broadcast %cst_10 : f32 to vector<1x128xf32>
    %34 = arith.mulf %33, %32 : vector<1x128xf32>
    %c0_11 = arith.constant 0 : index
    %c0_12 = arith.constant 0 : index
    %35 = vector.load %arg5[%c0_11, %c0_12] : memref<1x128xf32, #tpu.memory_space<vmem>>, vector<1x128xf32>
    tpu.vector_store %arg5[%c0_11, %c0_12], %34 {strides = array<i32>} : memref<1x128xf32, #tpu.memory_space<vmem>>, vector<1x128xf32>,
    return
  }
}

</mosaic_0001>

<bundles_post_ra>
// kernel: tpu_custom_call.1
= control target key start
LH: loop header
LB: loop body
LE: loop exit
PB: predicated region body
PF: predicated region fallthrough
CT: control target
= control target key end

     0   :  { %s996_s0 = inlined_call_operand.vmem [shape: f32[3,128], index: 0, kind: input, shape index: {}]   ;;  %s997_s1 = inlined_call_operand.vmem [shape: f32[128,3], index: 1, kind: input, shape index: {}]   ;;  %s998_s2 = inlined_call_operand.vmem [shape: f32[128,1], index: 2, kind: input, shape index: {}]   ;;  %s999_s3 = inlined_call_operand.vmem [shape: f32[128,1], index: 3, kind: input, shape index: {}]   ;;  %s1000_s4 = inlined_call_operand.<no memory space> [shape: f32[1,1], index: 4, kind: input, shape index: {}]   ;;  %s1001_s5 = inlined_call_operand.hbm [shape: f32[1,128], index: 5, kind: output, shape index: {}]  }
   0x1   :  { %v10_v0 = vstv %s1000_s4 }
   0x2   :  { %11 = vst [vmem:[#allocation2] sm:$0x1] %v10_v0 }
   0x3   :  { %v26_v1 = vld [vmem:[%s997_s1 + $0x10] sm:$0xff]  ;;  %v24_v2 = vld [vmem:[%s997_s1] sm:$0xff]  ;;  %v666_v3 = vmov 1   ;;  %v667_v4 = vmov 0   ;;  %v27_v5 = vld [vmem:[%s997_s1 + $0x18] sm:$0xff] }
   0x4   :  { %634 = vset.pattern.permute.xlu0 %v666_v3  ;;  %633 = vset.pattern.permute.xlu1 %v667_v4  ;;  %v29_v6 = vld [vmem:[%s997_s1 + $0x28] sm:$0xff]  ;;  %v31_v7 = vld [vmem:[%s997_s1 + $0x38] sm:$0xff] }
   0x5   :  { %52 = vperm.xlu1 %633, %v26_v1   ;;  %141 = vperm.xlu0 %634, %v24_v2  }
   0x9   :  { %57 = vperm.xlu1 %633, %v27_v5   ;;  %153 = vperm.xlu0 %634, %v27_v5  }
   0xd   :  { %67 = vperm.xlu1 %633, %v29_v6   ;;  %161 = vperm.xlu0 %634, %v29_v6  }
   0xe   :  { %12 = vsyncpa [#allocation4], 0  ;;  %v33_v8 = vld [vmem:[%s997_s1 + $0x48] sm:$0xff]  ;;  %v35_v9 = vld [vmem:[%s997_s1 + $0x58] sm:$0xff]  ;;  %v668_v13 = vmov 2   ;;  %v120_v32 = vlaneseq }
   0xf   :  { %v37_v10 = vld [vmem:[%s997_s1 + $0x68] sm:$0xff]  ;;  %v39_v11 = vld [vmem:[%s997_s1 + $0x78] sm:$0xff]  ;;  %v28_v14 = vld [vmem:[%s997_s1 + $0x20] sm:$0xff] }
  0x10   :  { %v25_v12 = vld [vmem:[%s997_s1 + $0x8] sm:$0xff]  ;;  %v30_v15 = vld [vmem:[%s997_s1 + $0x30] sm:$0xff]  ;;  %v32_v16 = vld [vmem:[%s997_s1 + $0x40] sm:$0xff]  ;;  %v796_v35 = vshrl.u32 %v120_v32, 7 }
  0x11   :  { %77 = vperm.xlu1 %633, %v31_v7   ;;  %169 = vperm.xlu0 %634, %v31_v7   ;;  %v34_v17 = vld [vmem:[%s997_s1 + $0x50] sm:$0xff]  ;;  %v36_v18 = vld [vmem:[%s997_s1 + $0x60] sm:$0xff]  ;;  %v343_v21 = vld [vmem:[%s998_s2 + $0x18] sm:$0xff] }
  0x12   :  { %v38_v19 = vld [vmem:[%s997_s1 + $0x70] sm:$0xff]  ;;  %v340_v20 = vld [vmem:[%s998_s2] sm:$0xff]  ;;  %v469_v22 = vld [vmem:[%s999_s3 + $0x8] sm:$0xff]  ;;  %v206_v38 = vsub.s32 1, %v796_v35  ;;  %v122_v39 = vsub.s32 0, %v796_v35 }
  0x13   :  { %v341_v23 = vld [vmem:[%s998_s2 + $0x8] sm:$0xff]  ;;  %v470_v24 = vld [vmem:[%s999_s3 + $0x10] sm:$0xff]  ;;  %v471_v26 = vld [vmem:[%s999_s3 + $0x18] sm:$0xff] }
  0x14   :  { %v342_v25 = vld [vmem:[%s998_s2 + $0x10] sm:$0xff]  ;;  %v468_v27 = vld [vmem:[%s999_s3] sm:$0xff]  ;;  %v473_v30 = vld [vmem:[%s999_s3 + $0x28] sm:$0xff] }
  0x15   :  { %87 = vperm.xlu1 %633, %v33_v8   ;;  %177 = vperm.xlu0 %634, %v33_v8   ;;  %v472_v28 = vld [vmem:[%s999_s3 + $0x20] sm:$0xff]  ;;  %v345_v31 = vld [vmem:[%s998_s2 + $0x28] sm:$0xff]  ;;  %v474_v33 = vld [vmem:[%s999_s3 + $0x30] sm:$0xff] }
  0x16   :  { %v344_v29 = vld [vmem:[%s998_s2 + $0x20] sm:$0xff]  ;;  %v346_v34 = vld [vmem:[%s998_s2 + $0x30] sm:$0xff]  ;;  %v475_v36 = vld [vmem:[%s999_s3 + $0x38] sm:$0xff] }
  0x17   :  { %v347_v37 = vld [vmem:[%s998_s2 + $0x38] sm:$0xff]  ;;  %v811_v41 = vld [vmem:[%s996_s0] sm:$0x7]  ;;  %v477_v49 = vld [vmem:[%s999_s3 + $0x48] sm:$0xff] }
  0x18   :  { %v476_v43 = vld [vmem:[%s999_s3 + $0x40] sm:$0xff]  ;;  %v819_v44 = vrot.slane %v811_v41, %v206_v38  ;;  %v827_v46 = vrot.slane %v811_v41, %v122_v39  ;;  %v349_v52 = vld [vmem:[%s998_s2 + $0x48] sm:$0xff]  ;;  %v478_v56 = vld [vmem:[%s999_s3 + $0x50] sm:$0xff] }
  0x19   :  { %97 = vperm.xlu1 %633, %v35_v9   ;;  %185 = vperm.xlu0 %634, %v35_v9   ;;  %v348_v45 = vld [vmem:[%s998_s2 + $0x40] sm:$0xff]  ;;  %v350_v59 = vld [vmem:[%s998_s2 + $0x50] sm:$0xff]  ;;  %v479_v63 = vld [vmem:[%s999_s3 + $0x58] sm:$0xff] }
  0x1d   :  { %107 = vperm.xlu1 %633, %v37_v10   ;;  %193 = vperm.xlu0 %634, %v37_v10  }
  0x21   :  { %117 = vperm.xlu1 %633, %v39_v11   ;;  %201 = vperm.xlu0 %634, %v39_v11  }
  0x25   :  { %635 = vset.pattern.permute.xlu1 %v666_v3  ;;  %637 = vset.pattern.permute.xlu0 %v668_v13 }
  0x26   :  { %145 = vperm.xlu1 %635, %v25_v12   ;;  %245 = vperm.xlu0 %637, %v25_v12  }
  0x2a   :  { %149 = vperm.xlu1 %635, %v26_v1   ;;  %257 = vperm.xlu0 %637, %v28_v14  }
  0x2e   :  { %157 = vperm.xlu1 %635, %v28_v14   ;;  %265 = vperm.xlu0 %637, %v30_v15  }
  0x32   :  { %165 = vperm.xlu1 %635, %v30_v15   ;;  %273 = vperm.xlu0 %637, %v32_v16  }
  0x36   :  { %173 = vperm.xlu1 %635, %v32_v16   ;;  %281 = vperm.xlu0 %637, %v34_v17  }
  0x3a   :  { %181 = vperm.xlu1 %635, %v34_v17   ;;  %289 = vperm.xlu0 %637, %v36_v18  }
  0x3e   :  { %189 = vperm.xlu1 %635, %v36_v18   ;;  %297 = vperm.xlu0 %637, %v38_v19  }
  0x42   :  { %197 = vperm.xlu1 %635, %v38_v19   ;;  %638 = vset.pattern.permute.xlu0 %v667_v4 }
  0x43   :  { %42 = vperm.xlu0 %638, %v24_v2  }
  0x46   :  { %636 = vset.pattern.permute.xlu1 %v668_v13  ;;  %v481_v13 = vld [vmem:[%s999_s3 + $0x68] sm:$0xff] }
  0x47   :  { %241 = vperm.xlu1 %636, %v24_v2   ;;  %47 = vperm.xlu0 %638, %v25_v12   ;;  %v351_v2 = vld [vmem:[%s998_s2 + $0x58] sm:$0xff] }
  0x4b   :  { %249 = vperm.xlu1 %636, %v26_v1   ;;  %62 = vperm.xlu0 %638, %v28_v14  }
  0x4f   :  { %253 = vperm.xlu1 %636, %v27_v5   ;;  %72 = vperm.xlu0 %638, %v30_v15  }
  0x53   :  { %261 = vperm.xlu1 %636, %v29_v6   ;;  %82 = vperm.xlu0 %638, %v32_v16   ;;  %v480_v6 = vld [vmem:[%s999_s3 + $0x60] sm:$0xff]  ;;  %v353_v16 = vld [vmem:[%s998_s2 + $0x68] sm:$0xff] }
  0x57   :  { %269 = vperm.xlu1 %636, %v31_v7   ;;  %92 = vperm.xlu0 %638, %v34_v17  }
  0x5b   :  { %277 = vperm.xlu1 %636, %v33_v8   ;;  %102 = vperm.xlu0 %638, %v36_v18  }
  0x5f   :  { %285 = vperm.xlu1 %636, %v35_v9   ;;  %112 = vperm.xlu0 %638, %v38_v19   ;;  %v352_v9 = vld [vmem:[%s998_s2 + $0x60] sm:$0xff] }
  0x63   :  { %293 = vperm.xlu1 %636, %v37_v10   ;;  %358 = vperm.xlu0 %638, %v340_v20   ;;  %v483_v20 = vld [vmem:[%s999_s3 + $0x78] sm:$0xff] }
  0x67   :  { %301 = vperm.xlu1 %636, %v39_v11   ;;  %373 = vperm.xlu0 %638, %v343_v21  }
  0x6b   :  { %639 = vset.pattern.permute.xlu1 %v667_v4  ;;  %491 = vperm.xlu0 %638, %v469_v22  }
  0x6c   :  { %363 = vperm.xlu1 %639, %v341_v23   ;;  %v354_v23 = vld [vmem:[%s998_s2 + $0x70] sm:$0xff] }
  0x6f   :  { %496 = vperm.xlu0 %638, %v470_v24  }
  0x70   :  { %368 = vperm.xlu1 %639, %v342_v25  }
  0x73   :  { %501 = vperm.xlu0 %638, %v471_v26  }
  0x74   :  { %486 = vperm.xlu1 %639, %v468_v27  }
  0x77   :  { %506 = vperm.xlu0 %638, %v472_v28  }
  0x78   :  { %378 = vperm.xlu1 %639, %v344_v29   ;;  %v355_v29 = vld [vmem:[%s998_s2 + $0x78] sm:$0xff]  ;;  %s669_s2 = smov [#allocation3]  }
  0x7b   :  { %511 = vperm.xlu0 %638, %v473_v30  }
  0x7c   :  { %383 = vperm.xlu1 %639, %v345_v31  }
  0x7f   :  { %516 = vperm.xlu0 %638, %v474_v33   ;;  %v482_v33 = vld [vmem:[%s999_s3 + $0x70] sm:$0xff]  ;;  %s621_s3 = sshll.u32 %s669_s2, 4  ;;  %s622_s3 = int_to_ptr.vmem [resolvable:$true] %s621_s3 }
  0x80   :  { %388 = vperm.xlu1 %639, %v346_v34   ;;  %s642_s0 = scalar_lea.vmem %s622_s3, 16  ;;  %s646_s10 = scalar_lea.vmem %s622_s3, 32 }
  0x81   :  { %p643_p0 = scmp.ne.s32.totalorder %s622_s3, %s642_s0  ;;  %p647_p1 = scmp.lt.s32.totalorder %s622_s3, %s622_s3 }
  0x82   :  { %p648_p2 = scmp.lt.s32.totalorder %s646_s10, %s642_s0 }
  0x83   :  { %521 = vperm.xlu0 %638, %v475_v36  }
  0x84   :  { %v806_v40 = vpop.permute.xlu1 %52  ;;  %393 = vperm.xlu1 %639, %v347_v37   ;;  %v813_v42 = vpop.permute.xlu0 %141  ;;  %v601_v37 = vld [vmem:[#allocation2] sm:$0x1]  ;;  %p649_p3 = por %p648_p2, %p647_p1 }
  0x85   :  { %v126_v38 = vmul.f32 %v827_v46, %v806_v40 }
  0x86   :  { %p650_p4 = pnand %p649_p3, %p643_p0 }
  0x87   :  { %526 = vperm.xlu0 %638, %v476_v43  }
  0x88   :  { %v58_v47 = vpop.permute.xlu1 %57  ;;  %398 = vperm.xlu1 %639, %v348_v45   ;;  %v154_v48 = vpop.permute.xlu0 %153 }
  0x89   :  { %v127_v50 = vmul.f32 %v827_v46, %v58_v47  ;;  %v211_v51 = vmul.f32 %v819_v44, %v154_v48 }
  0x8b   :  { %v837_v53 = vadd.f32 %v211_v51, %v127_v50  ;;  %531 = vperm.xlu0 %638, %v477_v49  }
  0x8c   :  { %v68_v54 = vpop.permute.xlu1 %67  ;;  %403 = vperm.xlu1 %639, %v349_v52   ;;  %v162_v55 = vpop.permute.xlu0 %161 }
  0x8d   :  { %v129_v57 = vmul.f32 %v827_v46, %v68_v54  ;;  %v213_v58 = vmul.f32 %v819_v44, %v162_v55 }
  0x8f   :  { %v847_v60 = vadd.f32 %v213_v58, %v129_v57  ;;  %536 = vperm.xlu0 %638, %v478_v56   ;;  %v306_v58 = vsub.s32 2, %v796_v35 }
  0x90   :  { %v78_v61 = vpop.permute.xlu1 %77  ;;  %408 = vperm.xlu1 %639, %v350_v59   ;;  %v170_v62 = vpop.permute.xlu0 %169 }
  0x91   :  { %v131_v0 = vmul.f32 %v827_v46, %v78_v61  ;;  %v215_v1 = vmul.f32 %v819_v44, %v170_v62  ;;  %v906_v40 = vrot.slane %v811_v41, %v306_v58 }
  0x93   :  { %v857_v3 = vadd.f32 %v215_v1, %v131_v0  ;;  %541 = vperm.xlu0 %638, %v479_v63  }
  0x94   :  { %v88_v4 = vpop.permute.xlu1 %87  ;;  %413 = vperm.xlu1 %639, %v351_v2   ;;  %v178_v5 = vpop.permute.xlu0 %177 }
  0x95   :  { %v133_v7 = vmul.f32 %v827_v46, %v88_v4  ;;  %v217_v8 = vmul.f32 %v819_v44, %v178_v5 }
  0x97   :  { %v867_v10 = vadd.f32 %v217_v8, %v133_v7  ;;  %546 = vperm.xlu0 %638, %v480_v6  }
  0x98   :  { %v98_v11 = vpop.permute.xlu1 %97  ;;  %418 = vperm.xlu1 %639, %v352_v9   ;;  %v186_v12 = vpop.permute.xlu0 %185 }
  0x99   :  { %v135_v14 = vmul.f32 %v827_v46, %v98_v11  ;;  %v219_v15 = vmul.f32 %v819_v44, %v186_v12 }
  0x9b   :  { %v877_v17 = vadd.f32 %v219_v15, %v135_v14  ;;  %551 = vperm.xlu0 %638, %v481_v13  }
  0x9c   :  { %v108_v18 = vpop.permute.xlu1 %107  ;;  %423 = vperm.xlu1 %639, %v353_v16   ;;  %v194_v19 = vpop.permute.xlu0 %193 }
  0x9d   :  { %v137_v21 = vmul.f32 %v827_v46, %v108_v18  ;;  %v221_v22 = vmul.f32 %v819_v44, %v194_v19 }
  0x9f   :  { %v887_v24 = vadd.f32 %v221_v22, %v137_v21  ;;  %561 = vperm.xlu0 %638, %v483_v20  }
  0xa0   :  { %v118_v25 = vpop.permute.xlu1 %117  ;;  %428 = vperm.xlu1 %639, %v354_v23   ;;  %v202_v26 = vpop.permute.xlu0 %201 }
  0xa1   :  { %v139_v27 = vmul.f32 %v827_v46, %v118_v25  ;;  %v223_v28 = vmul.f32 %v819_v44, %v202_v26 }
  0xa3   :  { %v894_v30 = vadd.f32 %v223_v28, %v139_v27 }
  0xa4   :  { %433 = vperm.xlu1 %639, %v355_v29  }
  0xa5   :  { %v146_v31 = vpop.permute.xlu1 %145  ;;  %v246_v32 = vpop.permute.xlu0 %245 }
  0xa6   :  { %v209_v0 = vmul.f32 %v819_v44, %v146_v31  ;;  %v309_v2 = vmul.f32 %v906_v40, %v246_v32 }
  0xa8   :  { %556 = vperm.xlu1 %639, %v482_v33  }
  0xa9   :  { %v150_v34 = vpop.permute.xlu1 %149  ;;  %v258_v36 = vpop.permute.xlu0 %257 }
  0xaa   :  { %v210_v43 = vmul.f32 %v819_v44, %v150_v34  ;;  %v312_v11 = vmul.f32 %v906_v40, %v258_v36 }
  0xac   :  { %v902_v45 = vadd.f32 %v210_v43, %v126_v38  ;;  %604 = vperm.xlu1 %639, %v601_v37  }
  0xad   :  { %v158_v47 = vpop.permute.xlu1 %157  ;;  %v266_v48 = vpop.permute.xlu0 %265 }
  0xae   :  { %v212_v7 = vmul.f32 %v819_v44, %v158_v47  ;;  %v314_v18 = vmul.f32 %v906_v40, %v266_v48 }
  0xb1   :  { %v166_v49 = vpop.permute.xlu1 %165  ;;  %v274_v50 = vpop.permute.xlu0 %273 }
  0xb2   :  { %v214_v14 = vmul.f32 %v819_v44, %v166_v49  ;;  %v316_v26 = vmul.f32 %v906_v40, %v274_v50 }
  0xb5   :  { %v174_v51 = vpop.permute.xlu1 %173  ;;  %v282_v52 = vpop.permute.xlu0 %281 }
  0xb6   :  { %v216_v22 = vmul.f32 %v819_v44, %v174_v51  ;;  %v318_v34 = vmul.f32 %v906_v40, %v282_v52 }
  0xb9   :  { %v182_v54 = vpop.permute.xlu1 %181  ;;  %v290_v55 = vpop.permute.xlu0 %289 }
  0xba   :  { %v218_v31 = vmul.f32 %v819_v44, %v182_v54  ;;  %v320_v49 = vmul.f32 %v906_v40, %v290_v55 }
  0xbd   :  { %v190_v56 = vpop.permute.xlu1 %189  ;;  %v298_v57 = vpop.permute.xlu0 %297 }
  0xbe   :  { %v220_v43 = vmul.f32 %v819_v44, %v190_v56 }
  0xc1   :  { %v198_v59 = vpop.permute.xlu1 %197 }
  0xc2   :  { %v43_v61 = vpop.permute.xlu0 %42  ;;  %v222_v58 = vmul.f32 %v819_v44, %v198_v59  ;;  %v208_v59 = vmul.f32 %v819_v44, %v813_v42 }
  0xc3   :  { %v124_v55 = vmul.f32 %v827_v46, %v43_v61 }
  0xc6   :  { %v242_v62 = vpop.permute.xlu1 %241  ;;  %v48_v63 = vpop.permute.xlu0 %47 }
  0xc7   :  { %v125_v1 = vmul.f32 %v827_v46, %v48_v63 }
  0xc9   :  { %v225_v4 = vadd.f32 %v209_v0, %v125_v1  ;;  %v322_v0 = vmul.f32 %v906_v40, %v298_v57 }
  0xca   :  { %v250_v5 = vpop.permute.xlu1 %249  ;;  %v63_v6 = vpop.permute.xlu0 %62 }
  0xcb   :  { %v128_v8 = vmul.f32 %v827_v46, %v63_v6  ;;  %v325_v9 = vadd.f32 %v309_v2, %v225_v4 }
  0xcd   :  { %v228_v41 = vadd.f32 %v212_v7, %v128_v8  ;;  %v308_v8 = vmul.f32 %v906_v40, %v242_v62 }
  0xce   :  { %v254_v12 = vpop.permute.xlu1 %253  ;;  %v73_v13 = vpop.permute.xlu0 %72 }
  0xcf   :  { %v130_v15 = vmul.f32 %v827_v46, %v73_v13  ;;  %v916_v16 = vadd.f32 %v312_v11, %v228_v41  ;;  %v224_v11 = vadd.f32 %v208_v59, %v124_v55  ;;  %v310_v41 = vmul.f32 %v906_v40, %v250_v5 }
  0xd1   :  { %v230_v19 = vadd.f32 %v214_v14, %v130_v15  ;;  %v311_v14 = vmul.f32 %v906_v40, %v254_v12  ;;  %v324_v15 = vadd.f32 %v308_v8, %v224_v11 }
  0xd2   :  { %v262_v20 = vpop.permute.xlu1 %261  ;;  %v83_v21 = vpop.permute.xlu0 %82 }
  0xd3   :  { %v132_v23 = vmul.f32 %v827_v46, %v83_v21  ;;  %v921_v25 = vadd.f32 %v314_v18, %v230_v19  ;;  %v313_v12 = vmul.f32 %v906_v40, %v262_v20 }
  0xd5   :  { %v232_v27 = vadd.f32 %v216_v22, %v132_v23  ;;  %v327_v22 = vadd.f32 %v311_v14, %v837_v53 }
  0xd6   :  { %v924_v28 = vpop.permute.xlu1 %269  ;;  %v93_v29 = vpop.permute.xlu0 %92 }
  0xd7   :  { %v134_v32 = vmul.f32 %v827_v46, %v93_v29  ;;  %v928_v33 = vadd.f32 %v316_v26, %v232_v27  ;;  %v315_v20 = vmul.f32 %v906_v40, %v924_v28 }
  0xd9   :  { %v234_v36 = vadd.f32 %v218_v31, %v134_v32 }
  0xda   :  { %v931_v37 = vpop.permute.xlu1 %277  ;;  %v103_v38 = vpop.permute.xlu0 %102 }
  0xdb   :  { %v136_v47 = vmul.f32 %v827_v46, %v103_v38  ;;  %v935_v48 = vadd.f32 %v318_v34, %v234_v36 }
  0xdd   :  { %v236_v50 = vadd.f32 %v220_v43, %v136_v47 }
  0xde   :  { %v938_v51 = vpop.permute.xlu1 %285  ;;  %v113_v54 = vpop.permute.xlu0 %112 }
  0xdf   :  { %v138_v52 = vmul.f32 %v827_v46, %v113_v54  ;;  %v942_v63 = vadd.f32 %v320_v49, %v236_v50  ;;  %v326_v46 = vadd.f32 %v310_v41, %v902_v45  ;;  %v329_v54 = vadd.f32 %v313_v12, %v847_v60 }
  0xe1   :  { %v238_v1 = vadd.f32 %v222_v58, %v138_v52 }
  0xe2   :  { %v945_v56 = vpop.permute.xlu1 %293  ;;  %v359_v2 = vpop.permute.xlu0 %358 }
  0xe3   :  { %v947_v4 = vadd.f32 %v322_v0, %v238_v1  ;;  %v436_v19 = vadd.f32 %v359_v2, %v324_v15  ;;  %v317_v15 = vmul.f32 %v906_v40, %v931_v37 }
  0xe5   :  { %v452_v44 = vmax.f32 %v436_v19, 0.0 }
  0xe6   :  { %v950_v6 = vpop.permute.xlu1 %301  ;;  %v374_v7 = vpop.permute.xlu0 %373 }
  0xe7   :  { %v439_v62 = vadd.f32 %v374_v7, %v327_v22 }
  0xe9   :  { %v455_v32 = vmax.f32 %v439_v62, 0.0 }
  0xea   :  { %v492_v57 = vpop.permute.xlu0 %491 }
  0xeb   :  { %v364_v13 = vpop.permute.xlu1 %363 }
  0xec   :  { %v437_v18 = vadd.f32 %v364_v13, %v325_v9 }
  0xee   :  { %v497_v21 = vpop.permute.xlu0 %496  ;;  %v453_v23 = vmax.f32 %v437_v18, 0.0 }
  0xef   :  { %v369_v61 = vpop.permute.xlu1 %368 }
  0xf0   :  { %v438_v42 = vadd.f32 %v369_v61, %v326_v46  ;;  %v565_v29 = vmul.f32 %v492_v57, %v453_v23  ;;  %v331_v57 = vadd.f32 %v315_v20, %v857_v3  ;;  %v323_v20 = vmul.f32 %v906_v40, %v950_v6 }
  0xf2   :  { %v454_v26 = vmax.f32 %v438_v42, 0.0  ;;  %v502_v27 = vpop.permute.xlu0 %501  ;;  %v333_v42 = vadd.f32 %v317_v15, %v867_v10 }
  0xf3   :  { %v487_v5 = vpop.permute.xlu1 %486  ;;  %v567_v45 = vmul.f32 %v502_v27, %v455_v32 }
  0xf4   :  { %v564_v31 = vmul.f32 %v487_v5, %v452_v44  ;;  %v566_v9 = vmul.f32 %v497_v21, %v454_v26  ;;  %v319_v26 = vmul.f32 %v906_v40, %v938_v51 }
  0xf6   :  { %v580_v34 = vadd.f32 %v565_v29, %v564_v31  ;;  %v507_v36 = vpop.permute.xlu0 %506 }
  0xf7   :  { %v379_v38 = vpop.permute.xlu1 %378 }
  0xf8   :  { %v581_v43 = vadd.f32 %v580_v34, %v566_v9  ;;  %v440_v53 = vadd.f32 %v379_v38, %v916_v16  ;;  %v335_v9 = vadd.f32 %v319_v26, %v877_v17 }
  0xfa   :  { %v582_v47 = vadd.f32 %v581_v43, %v567_v45  ;;  %v456_v49 = vmax.f32 %v440_v53, 0.0  ;;  %v512_v50 = vpop.permute.xlu0 %511  ;;  %v321_v45 = vmul.f32 %v906_v40, %v945_v56 }
  0xfb   :  { %v384_v58 = vpop.permute.xlu1 %383 }
  0xfc   :  { %v568_v52 = vmul.f32 %v507_v36, %v456_v49  ;;  %v441_v0 = vadd.f32 %v384_v58, %v329_v54  ;;  %v337_v58 = vadd.f32 %v321_v45, %v887_v24 }
  0xfe   :  { %v583_v1 = vadd.f32 %v582_v47, %v568_v52  ;;  %v457_v2 = vmax.f32 %v441_v0, 0.0  ;;  %v517_v55 = vpop.permute.xlu0 %516 }
  0xff   :  { %v389_v7 = vpop.permute.xlu1 %388 }
 0x100   :  { %v569_v59 = vmul.f32 %v512_v50, %v457_v2  ;;  %v442_v8 = vadd.f32 %v389_v7, %v921_v25 }
 0x102   :  { %v584_v11 = vadd.f32 %v583_v1, %v569_v59  ;;  %v458_v16 = vmax.f32 %v442_v8, 0.0  ;;  %v522_v41 = vpop.permute.xlu0 %521 }
 0x103   :  { %v394_v13 = vpop.permute.xlu1 %393 }
 0x104   :  { %v570_v60 = vmul.f32 %v517_v55, %v458_v16  ;;  %v443_v14 = vadd.f32 %v394_v13, %v331_v57 }
 0x106   :  { %v585_v18 = vadd.f32 %v584_v11, %v570_v60  ;;  %v459_v28 = vmax.f32 %v443_v14, 0.0  ;;  %v527_v19 = vpop.permute.xlu0 %526 }
 0x107   :  { %v399_v21 = vpop.permute.xlu1 %398 }
 0x108   :  { %v571_v46 = vmul.f32 %v522_v41, %v459_v28  ;;  %v444_v61 = vadd.f32 %v399_v21, %v928_v33 }
 0x10a   :  { %v586_v22 = vadd.f32 %v585_v18, %v571_v46  ;;  %v460_v25 = vmax.f32 %v444_v61, 0.0  ;;  %v532_v23 = vpop.permute.xlu0 %531 }
 0x10b   :  { %v404_v44 = vpop.permute.xlu1 %403 }
 0x10c   :  { %v572_v3 = vmul.f32 %v527_v19, %v460_v25  ;;  %v445_v62 = vadd.f32 %v404_v44, %v333_v42 }
 0x10e   :  { %v587_v27 = vadd.f32 %v586_v22, %v572_v3  ;;  %v461_v37 = vmax.f32 %v445_v62, 0.0  ;;  %v537_v5 = vpop.permute.xlu0 %536 }
 0x10f   :  { %v409_v29 = vpop.permute.xlu1 %408 }
 0x110   :  { %v573_v31 = vmul.f32 %v532_v23, %v461_v37  ;;  %v446_v12 = vadd.f32 %v409_v29, %v935_v48 }
 0x112   :  { %v588_v32 = vadd.f32 %v587_v27, %v573_v31  ;;  %v462_v33 = vmax.f32 %v446_v12, 0.0  ;;  %v542_v34 = vpop.permute.xlu0 %541 }
 0x113   :  { %v414_v36 = vpop.permute.xlu1 %413 }
 0x114   :  { %v574_v10 = vmul.f32 %v537_v5, %v462_v33  ;;  %v447_v38 = vadd.f32 %v414_v36, %v335_v9 }
 0x116   :  { %v589_v43 = vadd.f32 %v588_v32, %v574_v10  ;;  %v463_v51 = vmax.f32 %v447_v38, 0.0  ;;  %v547_v50 = vpop.permute.xlu0 %546 }
 0x117   :  { %v419_v53 = vpop.permute.xlu1 %418 }
 0x118   :  { %v575_v47 = vmul.f32 %v542_v34, %v463_v51  ;;  %v448_v49 = vadd.f32 %v419_v53, %v942_v63  ;;  %v339_v63 = vadd.f32 %v323_v20, %v894_v30 }
 0x11a   :  { %v590_v54 = vadd.f32 %v589_v43, %v575_v47  ;;  %v464_v48 = vmax.f32 %v448_v49, 0.0  ;;  %v552_v56 = vpop.permute.xlu0 %551 }
 0x11b   :  { %v424_v52 = vpop.permute.xlu1 %423 }
 0x11c   :  { %v576_v17 = vmul.f32 %v547_v50, %v464_v48  ;;  %v449_v0 = vadd.f32 %v424_v52, %v337_v58 }
 0x11e   :  { %v591_v1 = vadd.f32 %v590_v54, %v576_v17  ;;  %v465_v2 = vmax.f32 %v449_v0, 0.0  ;;  %v562_v60 = vpop.permute.xlu0 %561 }
 0x11f   :  { %v429_v55 = vpop.permute.xlu1 %428 }
 0x120   :  { %v577_v7 = vmul.f32 %v552_v56, %v465_v2  ;;  %v450_v59 = vadd.f32 %v429_v55, %v947_v4 }
 0x122   :  { %v592_v8 = vadd.f32 %v591_v1, %v577_v7  ;;  %v466_v41 = vmax.f32 %v450_v59, 0.0 }
 0x123   :  { %v434_v11 = vpop.permute.xlu1 %433 }
 0x124   :  { %v451_v16 = vadd.f32 %v434_v11, %v339_v63 }
 0x126   :  { %v467_v24 = vmax.f32 %v451_v16, 0.0 }
 0x127   :  { %v557_v57 = vpop.permute.xlu1 %556 }
 0x128   :  { %v578_v13 = vmul.f32 %v557_v57, %v466_v41  ;;  %v579_v14 = vmul.f32 %v562_v60, %v467_v24 }
 0x12a   :  { %v593_v15 = vadd.f32 %v592_v8, %v578_v13 }
 0x12b   :  { %v605_v21 = vpop.permute.xlu1 %604 }
 0x12c   :  { %v594_v40 = vadd.f32 %v593_v15, %v579_v14  ;;  %v610_v30 = vrot.slane %v605_v21, %v122_v39 }
 0x12e   :  { %v595_v6 = vrot.slane %v594_v40, 4 }
 0x130   :  { %v596_v18 = vadd.f32 %v595_v6, %v594_v40 }
 0x132   :  { %v597_v28 = vrot.slane %v596_v18, 2 }
 0x134   :  { %v598_v19 = vadd.f32 %v597_v28, %v596_v18 }
 0x136   :  { %v599_v46 = vrot.slane %v598_v19, 1 }
 0x138   :  { %v600_v4 = vadd.f32 %v599_v46, %v598_v19 }
 0x13a   :  { %v611_v61 = vadd.f32 %v610_v30, %v600_v4 }
 0x13c   :  { %640 = vtanh.f32 %v611_v61 }
 0x146   :  { %v641_v22 = vpop.eup %640 }
 0x147   :  { %v613_v25 = vmul.f32 2.0, %v641_v22 }
 0x149   :  { %614 = vst [vmem:[#allocation3] sm:$0x1] %v613_v25 }
 0x14a   :  { %653 = shalt.err (!%p650_p4)
}
 0x14b   :  { %s654_s13 = scalar_lea.hbm %s1001_s5, 16 }
 0x14c   :  { %p655_p5 = scmp.ne.s32.totalorder %s1001_s5, %s654_s13  ;;  %p658_p6 = scmp.lt.u32.totalorder %s654_s13, %s1001_s5 }
 0x14e   :  { %p660_p7 = pnand %p658_p6, %p655_p5 }
 0x150   :  { %663 = shalt.err (!%p660_p7)
}
 0x151   :  { %624 = dma.vmem_to_hbm [thread:$0]  %s622_s3, 16, %s1001_s5, [#allocation4]  }
 0x152   :  { %664 = dma.done.wait [#allocation4], 16  }
 0x153   :  { %665 = vsyncadd [#allocation4], 4294967280 }
 0x154   :  { %628 = vsyncpa [#allocation4], 1 }

</bundles_post_ra>
